<compile_context>
chip_gen: v7x
topology: tpu7x:2x2x1
jax: 0.10.0
libtpu: 0.0.40
codegen_flags: <defaults>
</compile_context>

<pallas_src>
import functools

import jax
import jax.numpy as jnp
from jax.experimental import pallas as pl
from jax.experimental.pallas import tpu as pltpu


_EPSILON = 1.0 / (1 << 24)          # matches _tensor_quant's epsilon
_LANE_WIDTH = 512                   # lane-dense slab width (multiple of 128)
_MAX_TILE_ROWS = 1024               # 1024 * 512 * 4 B = 2 MiB per block


# --------------------------- slab / tiling helper ---------------------------
def _lane_dense_slab(x, lane_width=_LANE_WIDTH, max_tile_rows=_MAX_TILE_ROWS):
    """Flatten x into a zero-padded, lane-dense (rows_padded, lane_width) slab.

    Zero padding is safe: it never increases the global abs-max and padded
    outputs are sliced off before reshaping back.
    """
    n = x.size
    rows = -(-n // lane_width)
    if rows <= max_tile_rows:
        tile_rows = -(-rows // 8) * 8          # single tile, sublane multiple of 8
    else:
        tile_rows = max_tile_rows              # already a multiple of 8
    rows_padded = -(-rows // tile_rows) * tile_rows
    pad = rows_padded * lane_width - n
    flat = x.reshape(-1)
    if pad:
        flat = jnp.pad(flat, (0, pad))
    return flat.reshape(rows_padded, lane_width), tile_rows


# ------------------------------ Pallas kernels ------------------------------
def _absmax_kernel(x_ref, amax_ref):
    """Global abs-max reduction; (1,1) accumulator lives in SMEM across the grid."""
    m = jnp.max(jnp.abs(x_ref[...].astype(jnp.float32)))

    @pl.when(pl.program_id(0) == 0)
    def _():
        amax_ref[0, 0] = jnp.float32(0.0)

    amax_ref[0, 0] = jnp.maximum(amax_ref[0, 0], m)


def _fakequant_kernel(amax_ref, x_ref, o_ref, *, max_bound):
    """out = clamp(round(x * (127/amax)), -127, 127) * (amax/127)  (amax<=eps -> 0)."""
    amax = amax_ref[0, 0]
    degenerate = amax <= jnp.float32(_EPSILON)
    q_scale = jnp.where(degenerate, jnp.float32(0.0),
                        jnp.float32(max_bound) / amax)
    # scale is reset to 1.0 in the degenerate branch before the final divide,
    # so the dequant multiplier is amax/max_bound normally and 1.0 otherwise.
    deq = jnp.where(degenerate, jnp.float32(1.0),
                    amax * jnp.float32(1.0 / max_bound))

    x = x_ref[...].astype(jnp.float32)
    q = jnp.clip(jnp.round(x * q_scale), -max_bound, max_bound)
    o_ref[...] = (q * deq).astype(o_ref.dtype)


# ------------------------------ host wrappers -------------------------------
def pallas_absmax(x):
    """Global max(|x|) as a (1, 1) float32 array, computed by a Pallas reduction."""
    xs, tile_rows = _lane_dense_slab(x)
    rows_padded, lane = xs.shape
    grid = (rows_padded // tile_rows,)
    nbytes = xs.size * xs.dtype.itemsize
    return pl.pallas_call(
        _absmax_kernel,
        out_shape=jax.ShapeDtypeStruct((1, 1), jnp.float32),
        grid=grid,
        in_specs=[pl.BlockSpec((tile_rows, lane), lambda i: (i, 0))],
        out_specs=pl.BlockSpec(memory_space=pltpu.MemorySpace.SMEM),
        compiler_params=pltpu.CompilerParams(
            dimension_semantics=("arbitrary",)),          # accumulator across grid
        cost_estimate=pl.CostEstimate(flops=2 * xs.size, transcendentals=0,
                                      bytes_accessed=nbytes + 4),
    )(xs)


def pallas_fake_quant(x, amax, num_bits=8):
    """Per-tensor symmetric fake quantization (quantize+dequantize) of x."""
    max_bound = float(2.0 ** (num_bits - 1) - 1.0)
    xs, tile_rows = _lane_dense_slab(x)
    rows_padded, lane = xs.shape
    grid = (rows_padded // tile_rows,)
    amax2 = jnp.reshape(jnp.asarray(amax, jnp.float32), (1, 1))
    nbytes = xs.size * xs.dtype.itemsize

    kernel = functools.partial(_fakequant_kernel, max_bound=max_bound)
    out = pl.pallas_call(
        kernel,
        out_shape=jax.ShapeDtypeStruct((rows_padded, lane), x.dtype),
        grid=grid,
        in_specs=[pl.BlockSpec(memory_space=pltpu.MemorySpace.SMEM),   # amax scalar
                  pl.BlockSpec((tile_rows, lane), lambda i: (i, 0))],
        out_specs=pl.BlockSpec((tile_rows, lane), lambda i: (i, 0)),
        compiler_params=pltpu.CompilerParams(
            dimension_semantics=("parallel",)),           # shard rows over v7x cores
        cost_estimate=pl.CostEstimate(flops=4 * xs.size, transcendentals=0,
                                      bytes_accessed=2 * nbytes + 4),
    )(amax2, xs)
    return out.reshape(-1)[: x.size].reshape(x.shape)


class LinearWeightQuantizer:
    """JAX/Pallas port of the PyTorch LinearWeightQuantizer forward pass."""

    def __init__(self, has_amax=True, num_bits=8, amax=None, **kwargs):
        del has_amax, kwargs  # ignored by the torch __init__ as well
        self.num_bits = int(num_bits)
        self._amax = None if amax is None else jnp.asarray(amax, jnp.float32)
        self.scale = None
        # TODO(synk): torch buffer registration / in-place amax setter mechanics are
        # host-side bookkeeping; kept as plain Python attributes here.

    def _get_amax(self, x):
        if self._amax is not None:
            return self._amax
        return pallas_absmax(x)

    @property
    def amax(self):
        return self._amax

    @amax.setter
    def amax(self, value):
        self._amax = jnp.asarray(value, jnp.float32)

    def __call__(self, x):
        amax = jnp.reshape(jnp.asarray(self._get_amax(x), jnp.float32), ())
        max_bound = 2.0 ** (self.num_bits - 1) - 1.0
        # Mirror _tensor_quant's post-reset scale that the module stores/uses.
        self.scale = jnp.where(amax <= _EPSILON, jnp.float32(1.0),
                               jnp.float32(max_bound) / amax)
        return pallas_fake_quant(x, amax, num_bits=self.num_bits)


# ------------------------------ pure-JAX reference ------------------------------
def _ref_fakequant(x, amax=None, num_bits=8):
    max_bound = 2.0 ** (num_bits - 1) - 1.0
    if amax is None:
        amax = jnp.max(jnp.abs(x))
    q_scale = jnp.where(amax <= _EPSILON, 0.0, max_bound / amax)
    q = jnp.clip(jnp.round(x * q_scale), -max_bound, max_bound)
    d_scale = jnp.where(amax <= _EPSILON, 1.0, max_bound / amax)
    return (q / d_scale).astype(x.dtype)


if __name__ == "__main__":
    key = jax.random.PRNGKey(0)
    kw, = jax.random.split(key, 1)

    # Small linear-layer weight, consistent with the module's intended use.
    out_features, in_features = 128, 256
    w = 0.05 * jax.random.normal(kw, (out_features, in_features), jnp.float32)

    # Path 1: no calibrated amax -> abs-max computed in Pallas.
    quantizer = LinearWeightQuantizer()
    out = quantizer(w)
    jax.block_until_ready(out)
    assert out.shape == w.shape and out.dtype == w.dtype
    assert bool(jnp.allclose(out, _ref_fakequant(w), atol=1e-5, rtol=1e-5))

    # Path 2: calibrated _amax buffer is present.
    quantizer_cal = LinearWeightQuantizer(amax=0.2)
    out_cal = quantizer_cal(w)
    jax.block_until_ready(out_cal)
    assert bool(jnp.allclose(out_cal, _ref_fakequant(w, amax=jnp.float32(0.2)),
                             atol=1e-5, rtol=1e-5))

    print("KERNEL_OK")
</pallas_src>

<mosaic_0001>
module attributes {stable_mosaic.version = 11 : i64} {
  func.func @_absmax_kernel(%arg0: i32, %arg1: memref<64x512xf32, #tpu.memory_space<vmem>>, %arg2: memref<1x1xf32, #tpu.memory_space<smem>>) attributes {dimension_semantics = [#tpu.dimension_semantics<arbitrary>], iteration_bounds = array<i64: 1>, scalar_prefetch = 0 : i64, scratch_operands = 0 : i64, tpu.core_type = #tpu.core_type<tc>, window_params = [{transform_indices = @transform_0, window_bounds = array<i64: 64, 512>}, {transform_indices = @transform_1, window_bounds = array<i64: 1, 1>}]} {
    %c0 = arith.constant 0 : index
    %c0_0 = arith.constant 0 : index
    %0 = vector.load %arg1[%c0, %c0_0] : memref<64x512xf32, #tpu.memory_space<vmem>>, vector<64x512xf32>
    %1 = math.absf %0 : vector<64x512xf32>
    %2 = vector.shape_cast %1 : vector<64x512xf32> to vector<1x64x512xf32>
    %cst = arith.constant dense<0xFF800000> : vector<1xf32>
    %3 = vector.multi_reduction <maximumf>, %2, %cst [1, 2] : vector<1x64x512xf32> to vector<1xf32>
    %4 = vector.shape_cast %3 : vector<1xf32> to vector<1x1x1xf32>
    %5 = vector.extract %4[0, 0, 0] : f32 from vector<1x1x1xf32>
    %c0_i32 = arith.constant 0 : i32
    %6 = arith.cmpi eq, %arg0, %c0_i32 : i32
    %7 = arith.extui %6 : i1 to i32
    %c0_i32_1 = arith.constant 0 : i32
    %8 = arith.cmpi ne, %7, %c0_i32_1 : i32
    scf.if %8 {
      %cst_6 = arith.constant 0.000000e+00 : f32
      %c0_7 = arith.constant 0 : index
      %c0_8 = arith.constant 0 : index
      %12 = memref.load %arg2[%c0_7, %c0_8] : memref<1x1xf32, #tpu.memory_space<smem>>
      memref.store %cst_6, %arg2[%c0_7, %c0_8] : memref<1x1xf32, #tpu.memory_space<smem>>
    } else {
    }
    %c0_2 = arith.constant 0 : index
    %c0_3 = arith.constant 0 : index
    %9 = memref.load %arg2[%c0_2, %c0_3] : memref<1x1xf32, #tpu.memory_space<smem>>
    %10 = arith.maximumf %9, %5 : f32
    %c0_4 = arith.constant 0 : index
    %c0_5 = arith.constant 0 : index
    %11 = memref.load %arg2[%c0_4, %c0_5] : memref<1x1xf32, #tpu.memory_space<smem>>
    memref.store %10, %arg2[%c0_4, %c0_5] : memref<1x1xf32, #tpu.memory_space<smem>>
    return
  }
  func.func @transform_0(%arg0: i32) -> (i32, i32) {
    %c0_i32 = arith.constant 0 : i32
    %c0_i32_0 = arith.constant 0 : i32
    return %arg0, %c0_i32 : i32, i32
  }
  func.func @transform_1(%arg0: i32) -> (i32, i32) {
    %c0_i32 = arith.constant 0 : i32
    %c0_i32_0 = arith.constant 0 : i32
    %c0_i32_1 = arith.constant 0 : i32
    return %c0_i32, %c0_i32_0 : i32, i32
  }
}

</mosaic_0001>

<bundles_post_ra>
// kernel: tpu_custom_call.1
= control target key start
LH: loop header
LB: loop body
LE: loop exit
PB: predicated region body
PF: predicated region fallthrough
CT: control target
= control target key end

     0   :  { %6 = vsyncpa [#allocation3], 0  ;;  %s250_s0 = inlined_call_operand.hbm [shape: f32[64,512], index: 0, kind: input, shape index: {}]   ;;  %s251_s1 = inlined_call_operand.hbm [shape: f32[1,1], index: 1, kind: output, shape index: {}]  }
   0x1   :  { %7 = vsyncpa [#allocation4], 0  ;;  %s211_s6 = smov [#allocation2]   ;;  %s158_s10 = scalar_lea.hbm %s250_s0, 4096 }
   0x2   :  { %s13_s7 = sshll.u32 %s211_s6, 4  ;;  %p159_p0 = scmp.ne.s32.totalorder %s250_s0, %s158_s10  ;;  %s14_s7 = int_to_ptr.vmem [resolvable:$true] %s13_s7 }
   0x3   :  { %p162_p1 = scmp.lt.u32.totalorder %s158_s10, %s250_s0 }
   0x5   :  { %p164_p2 = pnand %p162_p1, %p159_p0 }
   0x7   :  { %167 = shalt.err (!%p164_p2)
}
   0x8   :  { %s168_s15 = scalar_lea.vmem %s14_s7, 4096  ;;  %p173_p4 = scmp.lt.s32.totalorder %s14_s7, %s14_s7 }
   0x9   :  { %p169_p3 = scmp.ne.s32.totalorder %s14_s7, %s168_s15  ;;  %p174_p5 = scmp.lt.s32.totalorder %s168_s15, %s168_s15 }
   0xb   :  { %p175_p6 = por %p174_p5, %p173_p4 }
   0xd   :  { %p176_p7 = pnand %p175_p6, %p169_p3 }
   0xf   :  { %179 = shalt.err (!%p176_p7)
}
  0x10   :  { %s212_s16 = smov 512   ;;  %s213_s17 = smov 32  }
  0x11   :  { %19 = dma.hbm_to_vmem [thread:$0]  %s250_s0, 4096, %s14_s7, [#allocation3], %s212_s16, %s212_s16, %s213_s17  }
  0x12   :  { %190 = dma.done.wait [#allocation3], 4096  }
  0x13   :  { %191 = vsyncadd [#allocation3], 4294963200  ;;  %v23_v0 = vld [vmem:[#allocation2] sm:$0xff]  ;;  %v24_v1 = vld [vmem:[#allocation2 + $0x8] sm:$0xff]  ;;  %s214_s20 = smov 0.0   ;;  %s180_s24 = scalar_lea.hbm %s251_s1, 16 }
  0x14   :  { %v25_v2 = vld [vmem:[#allocation2 + $0x10] sm:$0xff]  ;;  %v27_v3 = vld [vmem:[#allocation2 + $0x20] sm:$0xff]  ;;  %v26_v4 = vld [vmem:[#allocation2 + $0x18] sm:$0xff]  ;;  %p181_p8 = scmp.ne.s32.totalorder %s251_s1, %s180_s24  ;;  %p184_p9 = scmp.lt.u32.totalorder %s180_s24, %s251_s1 }
  0x15   :  { %v28_v5 = vld [vmem:[#allocation2 + $0x28] sm:$0xff]  ;;  %v29_v6 = vld [vmem:[#allocation2 + $0x30] sm:$0xff]  ;;  %v30_v7 = vld [vmem:[#allocation2 + $0x38] sm:$0xff]  ;;  %194 = vmaxabs.init.f32.vacc0 %v23_v0, %v27_v3 }
  0x16   :  { %v31_v8 = vld [vmem:[#allocation2 + $0x40] sm:$0xff]  ;;  %v32_v9 = vld [vmem:[#allocation2 + $0x48] sm:$0xff]  ;;  %v33_v10 = vld [vmem:[#allocation2 + $0x50] sm:$0xff]  ;;  %p186_p10 = pnand %p184_p9, %p181_p8 }
  0x17   :  { %v34_v11 = vld [vmem:[#allocation2 + $0x58] sm:$0xff]  ;;  %v35_v12 = vld [vmem:[#allocation2 + $0x60] sm:$0xff]  ;;  %195 = vmaxabs.f32.vacc0 %v24_v1, %v28_v5  ;;  %v36_v13 = vld [vmem:[#allocation2 + $0x68] sm:$0xff] }
  0x18   :  { %v37_v14 = vld [vmem:[#allocation2 + $0x70] sm:$0xff]  ;;  %v38_v15 = vld [vmem:[#allocation2 + $0x78] sm:$0xff]  ;;  %v39_v16 = vld [vmem:[#allocation2 + $0x80] sm:$0xff] }
  0x19   :  { %196 = vmaxabs.f32.vacc0 %v25_v2, %v29_v6  ;;  %v40_v17 = vld [vmem:[#allocation2 + $0x88] sm:$0xff]  ;;  %v41_v18 = vld [vmem:[#allocation2 + $0x90] sm:$0xff]  ;;  %v42_v19 = vld [vmem:[#allocation2 + $0x98] sm:$0xff] }
  0x1a   :  { %v43_v20 = vld [vmem:[#allocation2 + $0xa0] sm:$0xff]  ;;  %v44_v21 = vld [vmem:[#allocation2 + $0xa8] sm:$0xff]  ;;  %v45_v22 = vld [vmem:[#allocation2 + $0xb0] sm:$0xff] }
  0x1b   :  { %197 = vmaxabs.f32.vacc0 %v26_v4, %v30_v7  ;;  %v46_v23 = vld [vmem:[#allocation2 + $0xb8] sm:$0xff]  ;;  %v47_v24 = vld [vmem:[#allocation2 + $0xc0] sm:$0xff]  ;;  %v48_v25 = vld [vmem:[#allocation2 + $0xc8] sm:$0xff] }
  0x1c   :  { %v49_v26 = vld [vmem:[#allocation2 + $0xd0] sm:$0xff]  ;;  %v50_v27 = vld [vmem:[#allocation2 + $0xd8] sm:$0xff]  ;;  %v51_v28 = vld [vmem:[#allocation2 + $0xe0] sm:$0xff] }
  0x1d   :  { %198 = vmaxabs.f32.vacc0 %v31_v8, %v32_v9  ;;  %v52_v29 = vld [vmem:[#allocation2 + $0xe8] sm:$0xff]  ;;  %v53_v30 = vld [vmem:[#allocation2 + $0xf0] sm:$0xff]  ;;  %v54_v31 = vld [vmem:[#allocation2 + $0xf8] sm:$0xff] }
  0x1f   :  { %199 = vmaxabs.f32.vacc0 %v33_v10, %v34_v11 }
  0x21   :  { %200 = vmaxabs.f32.vacc0 %v35_v12, %v36_v13 }
  0x23   :  { %201 = vmaxabs.f32.vacc0 %v37_v14, %v38_v15 }
  0x25   :  { %202 = vmaxabs.f32.vacc0 %v39_v16, %v40_v17 }
  0x27   :  { %203 = vmaxabs.f32.vacc0 %v41_v18, %v42_v19 }
  0x29   :  { %204 = vmaxabs.f32.vacc0 %v43_v20, %v44_v21 }
  0x2b   :  { %205 = vmaxabs.f32.vacc0 %v45_v22, %v46_v23 }
  0x2d   :  { %206 = vmaxabs.f32.vacc0 %v47_v24, %v48_v25 }
  0x2f   :  { %207 = vmaxabs.f32.vacc0 %v49_v26, %v50_v27 }
  0x31   :  { %208 = vmaxabs.f32.vacc0 %v51_v28, %v52_v29 }
  0x33   :  { %209 = vmaxabs.f32.vacc0 %v53_v30, %v54_v31 }
  0x35   :  { %v210_v32 = vmovacc.low.even.vacc0 }
  0x37   :  { %118 = vmax.xlane.f32.xlu0 %v210_v32 }
  0xc4   :  { %v119_v33 = vpop.xlane.xlu0 %118 }
  0xc5   :  { %v120_v34 = vrot.slane %v119_v33, 4 }
  0xc7   :  { %v121_v35 = vmax.f32 %v119_v33, %v120_v34 }
  0xc9   :  { %v122_v36 = vrot.slane %v121_v35, 2 }
  0xcb   :  { %v123_v37 = vmax.f32 %v121_v35, %v122_v36 }
  0xcd   :  { %v124_v38 = vrot.slane %v123_v37, 1 }
  0xcf   :  { %v125_v39 = vmax.f32 %v123_v37, %v124_v38 }
  0xd1   :  { %151 = vpush %v125_v39 }
 0x102   :  { %s152_s0 = spop %151 }
 0x103   :  { %s134_s21 = smax.f32 %s214_s20, %s152_s0 }
 0x104   :  { %136 = sst [smem:[#allocation5]] %s134_s21 }
 0x105   :  { %189 = shalt.err (!%p186_p10)
}
 0x106   :  { %s215_s29 = smov [#allocation5]  }
 0x107   :  { %144 = dma.smem_to_hbm %s215_s29, 16, %s251_s1, [#allocation4]  }
 0x108   :  { %192 = dma.done.wait [#allocation4], 16  }
 0x109   :  { %193 = vsyncadd [#allocation4], 4294967280 }
 0x10a   :  { %148 = sfence }
 0x10b   :  { %149 = vsyncpa [#allocation3], 1 }
 0x10c   :  { %150 = vsyncpa [#allocation4], 1 }

</bundles_post_ra>
